<compile_context>
chip_gen: v5e
topology: v5e:2x2
jax: 0.10.0
libtpu: 0.0.40
codegen_flags: <defaults>
</compile_context>

<pallas_src>
from typing import Optional, Union

import jax
import jax.numpy as jnp
from jax.experimental import pallas as pl
from jax.experimental.pallas import tpu as pltpu


_LANE = 128
_SUBLANE = 8
# ~2 MiB per block per buffer; double-buffered input + output ~= 8 MiB total.
_TARGET_BLOCK_BYTES = 2 * 1024 * 1024


def _round_up(x: int, m: int) -> int:
    return ((x + m - 1) // m) * m


def _choose_row_tile(n_rows: int, bytes_per_row: int, n_outer_steps: int) -> int:
    """Sublane row tile: a multiple of 8 (or the full extent), sized by bytes."""
    rows = max(
        _SUBLANE,
        (_TARGET_BLOCK_BYTES // max(bytes_per_row, 1)) // _SUBLANE * _SUBLANE,
    )
    if rows < n_rows:
        return rows  # multiple of 8; partial edge block is fine (elementwise)
    # A single tile would cover everything.  If the outer (batch) grid axis
    # alone cannot feed both v7x TensorCores, split the row axis in two.
    if n_outer_steps < 2 and n_rows > _SUBLANE:
        rows = _round_up(-(-n_rows // 2), _SUBLANE)
        if rows < n_rows:
            return rows
    return n_rows  # full extent (always a legal block dim)


def _choose_lane_tile(n_lanes: int, bytes_per_lane: int) -> int:
    """Lane tile for the non-128-aligned fallback: multiple of 128 or full."""
    lanes = max(
        _LANE,
        (_TARGET_BLOCK_BYTES // max(bytes_per_lane, 1)) // _LANE * _LANE,
    )
    if lanes < n_lanes:
        return lanes
    return n_lanes  # full extent (always a legal block dim)


# ---------------------------------------------------------------------------
# Kernels
# ---------------------------------------------------------------------------
def _relu_kernel(x_ref, o_ref):
    o_ref[...] = jnp.maximum(x_ref[...], 0)


def _mulmax_kernel(x_ref, o_ref):
    # Block: (1, 2, rows, lanes).  Channel halves are selected by a leading
    # index -> dense slabs, no sublane slicing, no concatenate.
    h1 = x_ref[0, 0]
    h2 = x_ref[0, 1]
    mul = h1 * h2
    o_ref[0, 0] = jnp.maximum(h1, mul)
    o_ref[0, 1] = jnp.maximum(h2, mul)


def _mulmax_residual_kernel(res_ref, x_ref, o_ref):
    h1 = x_ref[0, 0]
    h2 = x_ref[0, 1]
    r = res_ref[0, 0].astype(h1.dtype)  # scalar residual from SMEM
    mul = h1 * h2
    o_ref[0, 0] = jnp.maximum(h1, mul) + h1 * r
    o_ref[0, 1] = jnp.maximum(h2, mul) + h2 * r


# ---------------------------------------------------------------------------
# Wrappers
# ---------------------------------------------------------------------------
def _relu_pallas(x: jax.Array) -> jax.Array:
    """channels == 1 branch: plain ReLU over a dense (rows, 128) view."""
    N, C, H, W = x.shape
    L = N * C * H * W
    itemsize = jnp.dtype(x.dtype).itemsize

    if L % _LANE == 0:
        R = L // _LANE
        rows = _choose_row_tile(R, _LANE * itemsize, 1)
        x_view = x.reshape(R, _LANE)
        out = pl.pallas_call(
            _relu_kernel,
            out_shape=jax.ShapeDtypeStruct((R, _LANE), x.dtype),
            grid_spec=pltpu.PrefetchScalarGridSpec(
                num_scalar_prefetch=0,
                grid=(pl.cdiv(R, rows),),
                in_specs=[pl.BlockSpec((rows, _LANE), lambda r: (r, 0))],
                out_specs=pl.BlockSpec((rows, _LANE), lambda r: (r, 0)),
            ),
            compiler_params=pltpu.CompilerParams(
                dimension_semantics=("parallel",)
            ),
        )(x_view)
    else:
        lanes = _choose_lane_tile(L, itemsize)
        x_view = x.reshape(1, L)
        out = pl.pallas_call(
            _relu_kernel,
            out_shape=jax.ShapeDtypeStruct((1, L), x.dtype),
            grid_spec=pltpu.PrefetchScalarGridSpec(
                num_scalar_prefetch=0,
                grid=(pl.cdiv(L, lanes),),
                in_specs=[pl.BlockSpec((1, lanes), lambda s: (0, s))],
                out_specs=pl.BlockSpec((1, lanes), lambda s: (0, s)),
            ),
            compiler_params=pltpu.CompilerParams(
                dimension_semantics=("parallel",)
            ),
        )(x_view)
    return out.reshape(N, C, H, W)


def half_mulmax_pallas(
    x: jax.Array, residual: Optional[Union[float, jax.Array]] = None
) -> jax.Array:
    """Pallas implementation of half_mulmax for NCHW inputs."""
    N, C, H, W = x.shape

    if C == 1:
        # PyTorch ignores `residual` in the channels == 1 branch.
        return _relu_pallas(x)
    if C % 2 == 1:
        raise ValueError(
            f"`half_mulmax` got an odd number of channels: channels = {C!r}"
        )

    half = C // 2
    E = half * H * W  # per-half flat extent (contiguous in NCHW)
    itemsize = jnp.dtype(x.dtype).itemsize

    if E % _LANE == 0:
        # Dense path: (N, 2, R, 128) view, row-tiled -> full-width vregs/vst.
        R = E // _LANE
        rows = _choose_row_tile(R, 2 * _LANE * itemsize, N)
        x_view = x.reshape(N, 2, R, _LANE)
        grid = (N, pl.cdiv(R, rows))
        blk = (1, 2, rows, _LANE)
        idx = lambda n, s: (n, 0, s, 0)
        out_shape = jax.ShapeDtypeStruct((N, 2, R, _LANE), x.dtype)
    else:
        # Fallback for extents that are not 128-aligned: still a free reshape
        # and no pad/slice copies, at the cost of sublane-sparse vregs inside
        # the kernel.  Only triggers for odd spatial*half sizes.
        lanes = _choose_lane_tile(E, 2 * itemsize)
        x_view = x.reshape(N, 2, 1, E)
        grid = (N, pl.cdiv(E, lanes))
        blk = (1, 2, 1, lanes)
        idx = lambda n, s: (n, 0, 0, s)
        out_shape = jax.ShapeDtypeStruct((N, 2, 1, E), x.dtype)

    x_spec = pl.BlockSpec(blk, idx)
    o_spec = pl.BlockSpec(blk, idx)
    cparams = pltpu.CompilerParams(
        dimension_semantics=("parallel", "parallel")
    )

    if residual is None:
        out = pl.pallas_call(
            _mulmax_kernel,
            out_shape=out_shape,
            grid_spec=pltpu.PrefetchScalarGridSpec(
                num_scalar_prefetch=0,
                grid=grid,
                in_specs=[x_spec],
                out_specs=o_spec,
            ),
            compiler_params=cparams,
        )(x_view)
    else:
        res_arr = jnp.asarray(residual, dtype=jnp.float32)
        if res_arr.size != 1:
            # TODO(synk): non-scalar (broadcasting) tensor residuals are not
            # supported by this kernel; only scalar residual values.
            raise NotImplementedError(
                "half_mulmax_pallas only supports scalar residual values."
            )
        res_arr = res_arr.reshape(1, 1)
        out = pl.pallas_call(
            _mulmax_residual_kernel,
            out_shape=out_shape,
            grid_spec=pltpu.PrefetchScalarGridSpec(
                num_scalar_prefetch=0,
                grid=grid,
                in_specs=[
                    pl.BlockSpec(memory_space=pltpu.MemorySpace.SMEM),
                    x_spec,
                ],
                out_specs=o_spec,
            ),
            compiler_params=cparams,
        )(res_arr, x_view)

    return out.reshape(N, C, H, W)


class HalfMulMax:
    """JAX/Pallas equivalent of the PyTorch HalfMulMax module."""

    def __init__(self, residual: Optional[Union[float, jax.Array]] = None):
        self.residual = residual

    def __call__(self, x: jax.Array) -> jax.Array:
        return half_mulmax_pallas(x, residual=self.residual)


# ---------------------------------------------------------------------------
# Pure-JAX reference
# ---------------------------------------------------------------------------
def _reference(x: jax.Array, residual=None) -> jax.Array:
    C = x.shape[1]
    if C == 1:
        return jnp.maximum(x, 0.0)
    half = C // 2
    h1, h2 = x[:, :half], x[:, half:]
    mul = h1 * h2
    out = jnp.concatenate(
        [jnp.maximum(h1, mul), jnp.maximum(h2, mul)], axis=1
    )
    if residual is not None:
        out = out + x * residual
    return out


if __name__ == "__main__":
    key = jax.random.PRNGKey(0)

    # Main shape: batch=2, channels=4, spatial=16x16 (dense 128-aligned path)
    N, C, H, W = 2, 4, 16, 16
    x = jax.random.normal(key, (N, C, H, W), dtype=jnp.float32)

    # No-residual variant
    y = jax.block_until_ready(HalfMulMax(residual=None)(x))
    assert y.shape == (N, C, H, W)
    assert jnp.allclose(y, _reference(x, None), atol=1e-6), "mismatch (no residual)"

    # Scalar residual (python float)
    y_r = jax.block_until_ready(HalfMulMax(residual=0.5)(x))
    assert jnp.allclose(y_r, _reference(x, 0.5), atol=1e-6), "mismatch (residual)"

    # Scalar residual passed as a jax array (SMEM scalar path, no recompile)
    y_ra = jax.block_until_ready(HalfMulMax(residual=jnp.float32(0.25))(x))
    assert jnp.allclose(y_ra, _reference(x, 0.25), atol=1e-6), "mismatch (array residual)"

    # Non-128-aligned spatial*half extent (fallback path, partial/full block)
    k2 = jax.random.PRNGKey(1)
    x2 = jax.random.normal(k2, (2, 4, 10, 10), dtype=jnp.float32)
    y2 = jax.block_until_ready(HalfMulMax(residual=0.5)(x2))
    assert jnp.allclose(y2, _reference(x2, 0.5), atol=1e-6), "mismatch (fallback path)"

    # Dense path with batch==1 -> forced row split (>=2 grid steps) and a
    # partial edge block along the row axis.
    k4 = jax.random.PRNGKey(3)
    x4 = jax.random.normal(k4, (1, 4, 48, 48), dtype=jnp.float32)
    y4 = jax.block_until_ready(HalfMulMax(residual=0.3)(x4))
    assert jnp.allclose(y4, _reference(x4, 0.3), atol=1e-6), "mismatch (row split)"

    # channels == 1 -> ReLU path (dense)
    k3 = jax.random.PRNGKey(2)
    x3 = jax.random.normal(k3, (2, 1, 16, 16), dtype=jnp.float32)
    y3 = jax.block_until_ready(HalfMulMax(residual=None)(x3))
    assert jnp.allclose(y3, _reference(x3, None), atol=1e-6), "mismatch (C=1 relu)"

    # channels == 1, non-128-aligned total size -> ReLU fallback path
    k5 = jax.random.PRNGKey(4)
    x5 = jax.random.normal(k5, (1, 1, 10, 10), dtype=jnp.float32)
    y5 = jax.block_until_ready(HalfMulMax(residual=None)(x5))
    assert jnp.allclose(y5, _reference(x5, None), atol=1e-6), "mismatch (C=1 fallback)"

    print("KERNEL_OK")
</pallas_src>

<mosaic_0001>
module attributes {stable_mosaic.version = 11 : i64} {
  func.func @_mulmax_kernel(%arg0: i32, %arg1: i32, %arg2: memref<1x2x4x128xf32, #tpu.memory_space<vmem>>, %arg3: memref<1x2x4x128xf32, #tpu.memory_space<vmem>>) attributes {dimension_semantics = [#tpu.dimension_semantics<parallel>, #tpu.dimension_semantics<parallel>], iteration_bounds = array<i64: 2, 1>, scalar_prefetch = 0 : i64, scratch_operands = 0 : i64, tpu.core_type = #tpu.core_type<tc>, window_params = [{transform_indices = @transform_0, window_bounds = array<i64: 1, 2, 4, 128>}, {transform_indices = @transform_1, window_bounds = array<i64: 1, 2, 4, 128>}]} {
    %c0 = arith.constant 0 : index
    %c0_0 = arith.constant 0 : index
    %c0_1 = arith.constant 0 : index
    %c0_2 = arith.constant 0 : index
    %0 = vector.load %arg2[%c0, %c0_0, %c0_1, %c0_2] : memref<1x2x4x128xf32, #tpu.memory_space<vmem>>, vector<1x1x4x128xf32>
    %1 = vector.shape_cast %0 : vector<1x1x4x128xf32> to vector<4x128xf32>
    %c0_3 = arith.constant 0 : index
    %c1 = arith.constant 1 : index
    %c0_4 = arith.constant 0 : index
    %c0_5 = arith.constant 0 : index
    %2 = vector.load %arg2[%c0_3, %c1, %c0_4, %c0_5] : memref<1x2x4x128xf32, #tpu.memory_space<vmem>>, vector<1x1x4x128xf32>
    %3 = vector.shape_cast %2 : vector<1x1x4x128xf32> to vector<4x128xf32>
    %4 = arith.mulf %1, %3 : vector<4x128xf32>
    %5 = arith.maximumf %1, %4 : vector<4x128xf32>
    %c0_6 = arith.constant 0 : index
    %c0_7 = arith.constant 0 : index
    %c0_8 = arith.constant 0 : index
    %c0_9 = arith.constant 0 : index
    %6 = vector.load %arg3[%c0_6, %c0_7, %c0_8, %c0_9] : memref<1x2x4x128xf32, #tpu.memory_space<vmem>>, vector<1x1x4x128xf32>
    %7 = vector.shape_cast %6 : vector<1x1x4x128xf32> to vector<4x128xf32>
    %8 = vector.shape_cast %5 : vector<4x128xf32> to vector<1x1x4x128xf32>
    tpu.vector_store %arg3[%c0_6, %c0_7, %c0_8, %c0_9], %8 {strides = array<i32>} : memref<1x2x4x128xf32, #tpu.memory_space<vmem>>, vector<1x1x4x128xf32>,
    %9 = arith.maximumf %3, %4 : vector<4x128xf32>
    %c0_10 = arith.constant 0 : index
    %c1_11 = arith.constant 1 : index
    %c0_12 = arith.constant 0 : index
    %c0_13 = arith.constant 0 : index
    %10 = vector.load %arg3[%c0_10, %c1_11, %c0_12, %c0_13] : memref<1x2x4x128xf32, #tpu.memory_space<vmem>>, vector<1x1x4x128xf32>
    %11 = vector.shape_cast %10 : vector<1x1x4x128xf32> to vector<4x128xf32>
    %12 = vector.shape_cast %9 : vector<4x128xf32> to vector<1x1x4x128xf32>
    tpu.vector_store %arg3[%c0_10, %c1_11, %c0_12, %c0_13], %12 {strides = array<i32>} : memref<1x2x4x128xf32, #tpu.memory_space<vmem>>, vector<1x1x4x128xf32>,
    return
  }
  func.func @transform_0(%arg0: i32, %arg1: i32) -> (i32, i32, i32, i32) {
    %c0_i32 = arith.constant 0 : i32
    %c0_i32_0 = arith.constant 0 : i32
    %c0_i32_1 = arith.constant 0 : i32
    return %arg0, %c0_i32, %arg1, %c0_i32_0 : i32, i32, i32, i32
  }
  func.func @transform_1(%arg0: i32, %arg1: i32) -> (i32, i32, i32, i32) {
    %c0_i32 = arith.constant 0 : i32
    %c0_i32_0 = arith.constant 0 : i32
    %c0_i32_1 = arith.constant 0 : i32
    return %arg0, %c0_i32, %arg1, %c0_i32_0 : i32, i32, i32, i32
  }
}

</mosaic_0001>

<bundles_post_ra>
// kernel: tpu_custom_call.1
= control target key start
LH: loop header
LB: loop body
LE: loop exit
PB: predicated region body
PF: predicated region fallthrough
CT: control target
= control target key end

     0   :  { %6 = vsyncpa [#allocation3], 0  ;;  %s598_s0 = inlined_call_operand.hbm [shape: f32[2,2,4,128], index: 0, kind: input, shape index: {}]   ;;  %s599_s1 = inlined_call_operand.hbm [shape: f32[2,2,4,128], index: 1, kind: output, shape index: {}]  }
   0x1   :  { %8 = vsyncpa [#allocation3 + $0x1], 0 }
   0x2   :  { %9 = vsyncpa [#allocation4], 0 }
   0x3   :  { %11 = vsyncpa [#allocation4 + $0x1], 0  ;;  %s478_s6 = smov 0   ;;  %s480_s7 = smov 0  }
   0x4   :  { %s482_s8 = smov 0   ;;  %s484_s9 = smov 0  }
   0x5   :  { %s486_s10 = smov 0   ;;  %s488_s11 = smov 0  }
   0x6 LB: > { %s265_s12 = sadd.s32 4294967295, %s462_s11   ;;  %s266_s13 = sadd.s32 4294967294, %s462_s11   ;;  %s462_s11 = sphi %s488_s11, %s17_s11   ;;  %s458_s10 = sphi %s486_s10, %s608_s10   ;;  %s454_s9 = sphi %s484_s9, %s607_s9   ;;  %s450_s8 = sphi %s482_s8, %s606_s8   ;;  %s446_s7 = sphi %s480_s7, %s605_s7   ;;  %s442_s6 = sphi %s478_s6, %s604_s6  }
   0x7   : > { %s29_s14 = sadd.s32 1, %s458_s10  ;;  %s38_s15 = sadd.s32 1, %s450_s8 }
   0x8   : > { %p31_p0 = scmp.ge.s32.totalorder %s29_s14, 2  ;;  %p45_p1 = scmp.ne.s32.totalorder %s450_s8, %s446_s7 }
   0x9   : > { %p46_p2 = scmp.eq.s32.totalorder %s462_s11, 0  ;;  %p51_p3 = scmp.ne.s32.totalorder %s446_s7, %s442_s6 }
   0xa   : > { %s610_s14 = smov (%p31_p0, %s29_s14), 0  ;;  %p52_p5 = scmp.eq.s32.totalorder %s265_s12, 0 }
   0xb   : > { %p519_p4 = por %p46_p2, %p45_p1  ;;  %s33_s17 = ssub.s32 %s458_s10, %s610_s14 }
   0xc   : > { %p77_p6 = scmp.eq.s32.totalorder %s265_s12, 1  ;;  %p36_p7 = scmp.eq.s32.totalorder %s33_s17, 0 }
   0xd   : > { %p525_p8 = por %p52_p5, %p51_p3  ;;  %p83_p10 = scmp.eq.s32.totalorder %s266_s13, 1 }
   0xe   : > { %p529_p9 = por %p77_p6, %p45_p1  ;;  %p268_p12 = scmp.ge.s32.totalorder %s462_s11, 2 }
   0xf   : > { %s534_s20 = scalar_select %p36_p7, %s450_s8, %s38_s15  }
  0x10   : > { %p536_p11 = por %p83_p10, %p51_p3  ;;  %p296_p13 = scmp.lt.s32.totalorder %s462_s11, 2 }
  0x11   : > { %s103_s22 = sand.u32 1, %s450_s8   ;;  %s282_s24 = sshll.u32 %s458_s10, 3 }
  0x12   : > { %s269_s23 = sshll.u32 %s103_s22, 3  ;;  %s113_s27 = scalar_lea.hbm %s598_s0, %s282_s24 }
  0x13   : > { %s107_s28 = scalar_lea.vmem [#allocation2], %s269_s23  ;;  %s114_s30 = sshll.u32 %s113_s27, 4  ;;  %s115_s30 = int_to_ptr.hbm [resolvable:$true] %s114_s30 }
  0x14   : > { %s116_s29 = sshll.u32 %s107_s28, 4  ;;  %p289_p0 = pnand %p296_p13, %p519_p4  ;;  %s117_s29 = int_to_ptr.vmem [resolvable:$true] %s116_s29 }
  0x15   : > { %p272_p1 = scmp.ge.s32.totalorder %s462_s11, 1  ;;  %s104_s2 = scalar_lea.sflag [#allocation3], %s103_s22 }
  0x16   : > { %s464_s3 = smov 64   ;;  %s465_s4 = smov 4  }
  0x17   : > { %291 = dma.hbm_to_vmem [thread:$0]  (!%p289_p0), %s115_s30, 128, %s117_s29, %s104_s2, %s464_s3, %s464_s3, %s465_s4  }
  0x18   : > { %p124_p2 = scmp.lt.s32.totalorder %s462_s11, 3 }
  0x1a   : > { %p125_p3 = pnand %p272_p1, %p124_p2 }
  0x1b   : > { %s552_s5 = sand.u32 (!%p125_p3), 1, %s446_s7  }
  0x1c   : > { %128 = sbr.rel (%p125_p3) target bundleno = 50 (0x32), region = 24  ;;  %s273_s12 = sshll.u32 (!%p125_p3), %s552_s5, 3 }
  0x1d   : > { %s131_s13 = scalar_lea.sflag (!%p125_p3), [#allocation3], %s552_s5  ;;  %s134_s15 = scalar_lea.vmem (!%p125_p3), [#allocation2], %s273_s12 }
  0x21   : > { %433 = dma.done.wait (%p525_p8), %s131_s13, 128  }
  0x22   : > { %435 = vsyncadd (%p525_p8), %s131_s13, 4294967168  ;;  %s283_s16 = sshll.u32 %s454_s9, 3  ;;  %v154_v0 = vld [vmem:[%s134_s15] sm:$0xf]  ;;  %v275_v1 = vld [vmem:[%s134_s15 + $0x4] sm:$0xf] }
  0x23   : > { %s176_s23 = scalar_lea.hbm %s599_s1, %s283_s16  ;;  %s153_s24 = scalar_lea.vmem [#allocation5], %s273_s12  ;;  %v157_v2 = vmul.f32 %v275_v1, %v154_v0 }
  0x24   : > { %s177_s25 = sshll.u32 %s153_s24, 4  ;;  %s179_s26 = sshll.u32 %s176_s23, 4  ;;  %s178_s25 = int_to_ptr.vmem [resolvable:$true] %s177_s25  ;;  %s180_s26 = int_to_ptr.hbm [resolvable:$true] %s179_s26 }
  0x25   : > { %v158_v3 = vmax.f32 %v154_v0, %v157_v2  ;;  %v160_v4 = vmax.f32 %v275_v1, %v157_v2  ;;  %s164_s18 = scalar_lea.sflag [#allocation4], %s552_s5  ;;  %s394_s27 = sshra.s32 %s180_s26, 4  ;;  %s395_s27 = int_to_ptr.hbm [resolvable:$true] %s394_s27 }
  0x26   : > { %s396_s9 = scalar_lea.hbm %s395_s27, 8  ;;  %s400_s30 = scalar_lea.hbm %s599_s1, 16 }
  0x27   : > { %159 = vst [vmem:[%s153_s24] sm:$0xf] %v158_v3  ;;  %p397_p4 = scmp.ne.s32.totalorder %s395_s27, %s396_s9  ;;  %p401_p7 = scmp.lt.s32.totalorder %s395_s27, %s599_s1 }
  0x28   : > { %276 = vst [vmem:[%s153_s24 + $0x4] sm:$0xf] %v160_v4  ;;  %p402_p8 = scmp.lt.s32.totalorder %s400_s30, %s396_s9 }
  0x29   : > { %p398_p5 = pnand %p397_p4, %p529_p9 }
  0x2a   : > { %p403_p10 = por %p402_p8, %p401_p7 }
  0x2b   : > { %p399_p6 = pneg %p398_p5 }
  0x2d   : > { %p404_p13 = pnand %p403_p10, %p399_p6 }
  0x2f   : > { %407 = shalt.err (!%p404_p13)
}
  0x30   : > { %s466_s4 = smov 64   ;;  %s467_s5 = smov 4  }
  0x31   : > { %286 = dma.vmem_to_hbm [thread:$0]  (%p529_p9), %s178_s25, 128, %s180_s26, %s164_s18, %s466_s4, %s466_s4, %s467_s5  }
  0x32 PF: > { %s194_s12 = sand.u32 1, %s442_s6   ;;  %p293_p0 = pnand %p268_p12, %p536_p11 }
  0x33   : > { %s195_s13 = scalar_lea.sflag [#allocation4], %s194_s12 }
  0x34   : > { %p294_p1 = pneg %p293_p0 }
  0x36   : > { %437 = dma.done.wait (%p294_p1), %s195_s13, 128  }
  0x37   : > { %439 = vsyncadd (%p294_p1), %s195_s13, 4294967168  ;;  %s17_s11 = sadd.s32 1, %s462_s11   ;;  %s604_s6 = smov %s446_s7 }
  0x38   : > { %p14_p2 = scmp.ge.s32.totalorder %s17_s11, 4   ;;  %s605_s7 = smov %s450_s8 }
  0x39   : > { %s606_s8 = smov %s534_s20  ;;  %s607_s9 = smov %s458_s10 }
  0x3a   : > { %s608_s10 = smov %s610_s14  ;;  %16 = sbr.rel (!%p14_p2) target bundleno = 6 (0x6), region = 71 }
  0x3f   :  { %201 = vsyncpa [#allocation3], 1 }
  0x40   :  { %203 = vsyncpa [#allocation3 + $0x1], 1 }
  0x41   :  { %204 = vsyncpa [#allocation4], 1 }
  0x42   :  { %206 = vsyncpa [#allocation4 + $0x1], 1 }

</bundles_post_ra>
